<compile_context>
chip_gen: v6e
topology: v6e:2x2x1
jax: 0.10.0
libtpu: 0.0.40
codegen_flags: <defaults>
</compile_context>

<pallas_src>
import functools

import jax
import jax.numpy as jnp
from jax import lax
from jax.experimental import pallas as pl
from jax.experimental.pallas import tpu as pltpu

EPS_DIV = 1e-10


# ----------------------------------------------------------------------------
# In-kernel helpers
# ----------------------------------------------------------------------------
def _sum_all(v):
    """Full 2-D reduction -> (1, 1), staying in the vector domain."""
    return jnp.sum(jnp.sum(v, axis=1, keepdims=True), axis=0, keepdims=True)


def _small_matmul(a, x):
    """a: (M, K) tiny constant, x: (K, TP) lane-dense -> (M, TP).

    K broadcast-FMAs on the VPU instead of a K<=19 contraction on the MXU
    (avoids MXU fill/drain and relayouts for the tiny-K operand)."""
    out = a[:, 0:1] * x[0:1, :]
    for k in range(1, x.shape[0]):
        out = out + a[:, k:k + 1] * x[k:k + 1, :]
    return out


def _tile_attack_grad(x, rp, labels, wt, w, b, mean, std, inv_std,
                      eps_rp_scale, inv_count, *, ignore_label):
    """Per-tile PGD gradient.

    Returns (x_denorm, inp, grad) with
      x_denorm = inputs*std + mean
      inp      = clamp(x_denorm + eps*rp/(||rp||+1e-10), 0, 1)
      grad     = dCE(model((inp-mean)/std), labels)/dinp   (mean over valid px)
    eps_rp_scale = eps/(||rp||+1e-10) and inv_count = 1/count are global
    scalars computed by earlier passes.
    """
    x_d = x * std + mean
    inp = jnp.clip(x_d + eps_rp_scale * rp, 0.0, 1.0)
    xn = (inp - mean) * inv_std
    logits = _small_matmul(wt, xn) + b                       # (C, TP)

    m = jnp.max(logits, axis=0, keepdims=True)               # (1, TP)
    e = jnp.exp(logits - m)
    s = jnp.sum(e, axis=0, keepdims=True)
    probs = e * pl.reciprocal(s, approx=True)

    classes = lax.broadcasted_iota(jnp.int32, logits.shape, 0)
    onehot = (classes == labels).astype(jnp.float32)
    valid = (labels != ignore_label).astype(jnp.float32)     # (1, TP)

    g_logits = (probs - onehot) * (valid * inv_count)        # (C, TP)
    grad = _small_matmul(w, g_logits) * inv_std              # (3, TP)
    return x_d, inp, grad


# ----------------------------------------------------------------------------
# Pass 1: global ||rp||^2 and valid-pixel count
# ----------------------------------------------------------------------------
def _reduce_kernel(rp_ref, lab_ref, rpsq_ref, cnt_ref, *, ignore_label):
    @pl.when(pl.program_id(0) == 0)
    def _():
        rpsq_ref[...] = jnp.zeros_like(rpsq_ref)
        cnt_ref[...] = jnp.zeros_like(cnt_ref)

    rp = rp_ref[...]
    valid = (lab_ref[...] != ignore_label).astype(jnp.float32)
    rpsq_ref[...] += _sum_all(rp * rp)
    cnt_ref[...] += _sum_all(valid)


# ----------------------------------------------------------------------------
# Pass 2: global ||dCE/dinp||^2
# ----------------------------------------------------------------------------
def _gradnorm_kernel(x_ref, rp_ref, lab_ref, scal_ref, wt_ref, w_ref, b_ref,
                     mean_ref, std_ref, istd_ref, gsq_ref, *, ignore_label):
    @pl.when(pl.program_id(0) == 0)
    def _():
        gsq_ref[...] = jnp.zeros_like(gsq_ref)

    eps_rp_scale = scal_ref[0, 0]
    inv_count = scal_ref[0, 1]
    _, _, grad = _tile_attack_grad(
        x_ref[...], rp_ref[...], lab_ref[...], wt_ref[...], w_ref[...],
        b_ref[...], mean_ref[...], std_ref[...], istd_ref[...],
        eps_rp_scale, inv_count, ignore_label=ignore_label)
    gsq_ref[...] += _sum_all(grad * grad)


# ----------------------------------------------------------------------------
# Pass 3: apply PGD step, model forward on adversarial input, CE loss
# ----------------------------------------------------------------------------
def _attack_fwd_loss_kernel(x_ref, rp_ref, lab_ref, scal_ref, wt_ref, w_ref,
                            b_ref, mean_ref, std_ref, istd_ref,
                            logits_ref, loss_ref, *, ignore_label):
    i = pl.program_id(0)

    @pl.when(i == 0)
    def _():
        loss_ref[...] = jnp.zeros_like(loss_ref)

    labels = lab_ref[...]
    mean = mean_ref[...]
    inv_std = istd_ref[...]
    wt = wt_ref[...]
    b = b_ref[...]
    eps_rp_scale = scal_ref[0, 0]
    inv_count = scal_ref[0, 1]
    step_scale = scal_ref[0, 2]          # step_size / (||grad|| + 1e-10)

    x_d, inp, grad = _tile_attack_grad(
        x_ref[...], rp_ref[...], labels, wt, w_ref[...], b, mean,
        std_ref[...], inv_std, eps_rp_scale, inv_count,
        ignore_label=ignore_label)

    # inp = inp + grad/(||grad||+1e-10) * step_size
    inp = inp + grad * step_scale
    # diff = inp - inputs ; (renorm in the reference is a no-op) ; clamp
    diff = inp - x_d
    inp = jnp.clip(inp + diff, 0.0, 1.0)
    x_adv = (inp - mean) * inv_std       # attack() return value (normalized)

    # FullModel forward: outputs = model(x_adv) ; loss = CE(outputs, labels)
    logits = _small_matmul(wt, x_adv) + b                    # (C, TP)
    logits_ref[...] = logits

    m = jnp.max(logits, axis=0, keepdims=True)
    z = logits - m
    lse = jnp.log(jnp.sum(jnp.exp(z), axis=0, keepdims=True))
    classes = lax.broadcasted_iota(jnp.int32, logits.shape, 0)
    onehot = (classes == labels).astype(jnp.float32)
    valid = (labels != ignore_label).astype(jnp.float32)
    logp_lab = jnp.sum((z - lse) * onehot, axis=0, keepdims=True)   # (1, TP)
    loss_ref[...] += _sum_all(-logp_lab * valid)

    @pl.when(i == pl.num_programs(0) - 1)
    def _():
        loss_ref[...] = loss_ref[...] * inv_count


# ----------------------------------------------------------------------------
# Host-side wrapper: layout transforms + the three pallas_calls
# ----------------------------------------------------------------------------
def _round_up(x, m):
    return ((x + m - 1) // m) * m


def pgd_train_forward(inputs_nchw, labels_nhw, rp_nchw, w, b, mean3, std3,
                      *, num_classes, ignore_label, eps=0.05, steps=1,
                      tile_p_max=8192):
    N, Cin, H, W = inputs_nchw.shape
    assert Cin == 3
    C = num_classes
    P = N * H * W
    step_size = eps * 1.2 / steps

    TP = _round_up(P, 128) if P <= tile_p_max else tile_p_max
    P_pad = _round_up(P, TP)
    ntiles = P_pad // TP

    f32 = jnp.float32
    # NCHW -> lane-dense (channels, P); pad P with ignore-labeled zero pixels
    # (padded pixels contribute nothing to any global reduction).
    x_cp = jnp.transpose(inputs_nchw, (1, 0, 2, 3)).reshape(3, P).astype(f32)
    rp_cp = jnp.transpose(rp_nchw, (1, 0, 2, 3)).reshape(3, P).astype(f32)
    lab_cp = labels_nhw.reshape(1, P).astype(jnp.int32)
    if P_pad != P:
        pad = P_pad - P
        x_cp = jnp.pad(x_cp, ((0, 0), (0, pad)))
        rp_cp = jnp.pad(rp_cp, ((0, 0), (0, pad)))
        lab_cp = jnp.pad(lab_cp, ((0, 0), (0, pad)),
                         constant_values=ignore_label)

    w_3c = jnp.asarray(w, f32)                        # (3, C)
    wt_c3 = w_3c.T                                    # (C, 3) pre-transposed
    b_c1 = jnp.asarray(b, f32).reshape(C, 1)          # (C, 1)
    mean_31 = jnp.asarray(mean3, f32).reshape(3, 1)
    std_31 = jnp.asarray(std3, f32).reshape(3, 1)
    istd_31 = 1.0 / std_31

    cparams = pltpu.CompilerParams(dimension_semantics=("arbitrary",))
    smem_spec = pl.BlockSpec(memory_space=pltpu.MemorySpace.SMEM)

    tile3 = pl.BlockSpec((3, TP), lambda i: (0, i))
    tile1 = pl.BlockSpec((1, TP), lambda i: (0, i))
    tileC = pl.BlockSpec((C, TP), lambda i: (0, i))
    acc11 = pl.BlockSpec((1, 1), lambda i: (0, 0))
    f11 = jax.ShapeDtypeStruct((1, 1), f32)

    def const(shape):
        return pl.BlockSpec(shape, lambda i: (0, 0))

    const_specs = [const((C, 3)), const((3, C)), const((C, 1)),
                   const((3, 1)), const((3, 1)), const((3, 1))]
    const_args = (wt_c3, w_3c, b_c1, mean_31, std_31, istd_31)

    # ---- pass 1: ||rp||^2 and valid-pixel count ---------------------------
    rp_sq, cnt = pl.pallas_call(
        functools.partial(_reduce_kernel, ignore_label=ignore_label),
        out_shape=(f11, f11),
        grid=(ntiles,),
        in_specs=[tile3, tile1],
        out_specs=(acc11, acc11),
        compiler_params=cparams,
    )(rp_cp, lab_cp)

    count = jnp.maximum(cnt[0, 0], 1.0)
    inv_count = 1.0 / count
    eps_rp_scale = eps / (jnp.sqrt(rp_sq[0, 0]) + EPS_DIV)
    scal2 = jnp.stack([eps_rp_scale, inv_count]).reshape(1, 2)

    # ---- pass 2: ||dCE/dinp||^2 -------------------------------------------
    g_sq = pl.pallas_call(
        functools.partial(_gradnorm_kernel, ignore_label=ignore_label),
        out_shape=f11,
        grid=(ntiles,),
        in_specs=[tile3, tile3, tile1, smem_spec] + const_specs,
        out_specs=acc11,
        compiler_params=cparams,
    )(x_cp, rp_cp, lab_cp, scal2, *const_args)

    step_scale = step_size / (jnp.sqrt(g_sq[0, 0]) + EPS_DIV)
    scal3 = jnp.stack([eps_rp_scale, inv_count, step_scale]).reshape(1, 3)

    # ---- pass 3: PGD step + model forward + CE loss -----------------------
    logits_cp, loss = pl.pallas_call(
        functools.partial(_attack_fwd_loss_kernel, ignore_label=ignore_label),
        out_shape=(jax.ShapeDtypeStruct((C, P_pad), f32), f11),
        grid=(ntiles,),
        in_specs=[tile3, tile3, tile1, smem_spec] + const_specs,
        out_specs=(tileC, acc11),
        compiler_params=cparams,
    )(x_cp, rp_cp, lab_cp, scal3, *const_args)

    # (C, P) -> NCHW outputs; loss -> shape (1,) (== torch.unsqueeze(loss, 0))
    outputs = jnp.transpose(logits_cp[:, :P].reshape(C, N, H, W), (1, 0, 2, 3))
    return loss.reshape(1), outputs


if __name__ == "__main__":
    N, Cin, H, W = 2, 3, 16, 16
    NUM_CLASSES = 8
    IGNORE_LABEL = 255

    key = jax.random.PRNGKey(0)
    k_x, k_rp, k_w, k_b, k_lab, k_ign = jax.random.split(key, 6)

    # Deterministic synthetic parameters (1x1-conv head) and normalization stats.
    w = jax.random.normal(k_w, (3, NUM_CLASSES), jnp.float32) * 0.1
    b = jax.random.normal(k_b, (1, NUM_CLASSES), jnp.float32) * 0.01
    mean3 = jnp.array([0.485, 0.456, 0.406], jnp.float32)
    std3 = jnp.array([0.229, 0.224, 0.225], jnp.float32)

    # Example inputs (already mean/std-normalized images, like the torch module).
    inputs = jax.random.normal(k_x, (N, Cin, H, W), jnp.float32)
    labels = jax.random.randint(k_lab, (N, H, W), 0, NUM_CLASSES).astype(jnp.int32)
    ignore_mask = jax.random.uniform(k_ign, (N, H, W)) < 0.1
    labels = jnp.where(ignore_mask, IGNORE_LABEL, labels)
    # torch.randn_like(inputs) equivalent, generated deterministically host-side.
    rp = jax.random.normal(k_rp, (N, Cin, H, W), jnp.float32)

    loss, outputs = pgd_train_forward(
        inputs, labels, rp, w, b, mean3, std3,
        num_classes=NUM_CLASSES, ignore_label=IGNORE_LABEL, eps=0.05, steps=1)

    jax.block_until_ready((loss, outputs))
    assert loss.shape == (1,)
    assert outputs.shape == (N, NUM_CLASSES, H, W)
    assert bool(jnp.isfinite(loss).all()) and bool(jnp.isfinite(outputs).all())
    print("KERNEL_OK")
</pallas_src>

<mosaic_0001>
module attributes {stable_mosaic.version = 11 : i64} {
  func.func @_reduce_kernel(%arg0: i32, %arg1: memref<3x512xf32, #tpu.memory_space<vmem>>, %arg2: memref<1x512xi32, #tpu.memory_space<vmem>>, %arg3: memref<1x1xf32, #tpu.memory_space<vmem>>, %arg4: memref<1x1xf32, #tpu.memory_space<vmem>>) attributes {dimension_semantics = [#tpu.dimension_semantics<arbitrary>], iteration_bounds = array<i64: 1>, scalar_prefetch = 0 : i64, scratch_operands = 0 : i64, tpu.core_type = #tpu.core_type<tc>, window_params = [{transform_indices = @transform_0, window_bounds = array<i64: 3, 512>}, {transform_indices = @transform_1, window_bounds = array<i64: 1, 512>}, {pipeline_mode = #tpu.pipeline_mode<synchronous>, transform_indices = @transform_2, window_bounds = array<i64: 1, 1>}, {pipeline_mode = #tpu.pipeline_mode<synchronous>, transform_indices = @transform_3, window_bounds = array<i64: 1, 1>}]} {
    %c0_i32 = arith.constant 0 : i32
    %0 = arith.cmpi eq, %arg0, %c0_i32 : i32
    %1 = arith.extui %0 : i1 to i32
    %c0_i32_0 = arith.constant 0 : i32
    %2 = arith.cmpi ne, %1, %c0_i32_0 : i32
    scf.if %2 {
      %cst_15 = arith.constant 0.000000e+00 : f32
      %24 = vector.broadcast %cst_15 : f32 to vector<1x1xf32>
      %c0_16 = arith.constant 0 : index
      %c0_17 = arith.constant 0 : index
      %25 = vector.load %arg3[%c0_16, %c0_17] : memref<1x1xf32, #tpu.memory_space<vmem>>, vector<1x1xf32>
      tpu.vector_store %arg3[%c0_16, %c0_17], %24 {strides = array<i32>} : memref<1x1xf32, #tpu.memory_space<vmem>>, vector<1x1xf32>,
      %cst_18 = arith.constant 0.000000e+00 : f32
      %26 = vector.broadcast %cst_18 : f32 to vector<1x1xf32>
      %c0_19 = arith.constant 0 : index
      %c0_20 = arith.constant 0 : index
      %27 = vector.load %arg4[%c0_19, %c0_20] : memref<1x1xf32, #tpu.memory_space<vmem>>, vector<1x1xf32>
      tpu.vector_store %arg4[%c0_19, %c0_20], %26 {strides = array<i32>} : memref<1x1xf32, #tpu.memory_space<vmem>>, vector<1x1xf32>,
    } else {
    }
    %c0 = arith.constant 0 : index
    %c0_1 = arith.constant 0 : index
    %3 = vector.load %arg1[%c0, %c0_1] : memref<3x512xf32, #tpu.memory_space<vmem>>, vector<3x512xf32>
    %c0_2 = arith.constant 0 : index
    %c0_3 = arith.constant 0 : index
    %4 = vector.load %arg2[%c0_2, %c0_3] : memref<1x512xi32, #tpu.memory_space<vmem>>, vector<1x512xi32>
    %c255_i32 = arith.constant 255 : i32
    %5 = vector.broadcast %c255_i32 : i32 to vector<1x512xi32>
    %6 = arith.cmpi ne, %4, %5 : vector<1x512xi32>
    %7 = arith.extui %6 : vector<1x512xi1> to vector<1x512xi32>
    %8 = arith.sitofp %7 : vector<1x512xi32> to vector<1x512xf32>
    %c0_4 = arith.constant 0 : index
    %c0_5 = arith.constant 0 : index
    %9 = vector.load %arg3[%c0_4, %c0_5] : memref<1x1xf32, #tpu.memory_space<vmem>>, vector<1x1xf32>
    %10 = arith.mulf %3, %3 : vector<3x512xf32>
    %cst = arith.constant dense<0.000000e+00> : vector<3xf32>
    %11 = vector.multi_reduction <add>, %10, %cst [1] : vector<3x512xf32> to vector<3xf32>
    %12 = vector.shape_cast %11 : vector<3xf32> to vector<3x1xf32>
    %cst_6 = arith.constant dense<0.000000e+00> : vector<1xf32>
    %13 = vector.multi_reduction <add>, %12, %cst_6 [0] : vector<3x1xf32> to vector<1xf32>
    %14 = vector.shape_cast %13 : vector<1xf32> to vector<1x1xf32>
    %15 = arith.addf %9, %14 : vector<1x1xf32>
    %c0_7 = arith.constant 0 : index
    %c0_8 = arith.constant 0 : index
    %16 = vector.load %arg3[%c0_7, %c0_8] : memref<1x1xf32, #tpu.memory_space<vmem>>, vector<1x1xf32>
    tpu.vector_store %arg3[%c0_7, %c0_8], %15 {strides = array<i32>} : memref<1x1xf32, #tpu.memory_space<vmem>>, vector<1x1xf32>,
    %c0_9 = arith.constant 0 : index
    %c0_10 = arith.constant 0 : index
    %17 = vector.load %arg4[%c0_9, %c0_10] : memref<1x1xf32, #tpu.memory_space<vmem>>, vector<1x1xf32>
    %cst_11 = arith.constant dense<0.000000e+00> : vector<1xf32>
    %18 = vector.multi_reduction <add>, %8, %cst_11 [1] : vector<1x512xf32> to vector<1xf32>
    %19 = vector.shape_cast %18 : vector<1xf32> to vector<1x1xf32>
    %cst_12 = arith.constant dense<0.000000e+00> : vector<1xf32>
    %20 = vector.multi_reduction <add>, %19, %cst_12 [0] : vector<1x1xf32> to vector<1xf32>
    %21 = vector.shape_cast %20 : vector<1xf32> to vector<1x1xf32>
    %22 = arith.addf %17, %21 : vector<1x1xf32>
    %c0_13 = arith.constant 0 : index
    %c0_14 = arith.constant 0 : index
    %23 = vector.load %arg4[%c0_13, %c0_14] : memref<1x1xf32, #tpu.memory_space<vmem>>, vector<1x1xf32>
    tpu.vector_store %arg4[%c0_13, %c0_14], %22 {strides = array<i32>} : memref<1x1xf32, #tpu.memory_space<vmem>>, vector<1x1xf32>,
    return
  }
  func.func @transform_0(%arg0: i32) -> (i32, i32) {
    %c0_i32 = arith.constant 0 : i32
    %c0_i32_0 = arith.constant 0 : i32
    return %c0_i32, %arg0 : i32, i32
  }
  func.func @transform_1(%arg0: i32) -> (i32, i32) {
    %c0_i32 = arith.constant 0 : i32
    %c0_i32_0 = arith.constant 0 : i32
    return %c0_i32, %arg0 : i32, i32
  }
  func.func @transform_2(%arg0: i32) -> (i32, i32) {
    %c0_i32 = arith.constant 0 : i32
    %c0_i32_0 = arith.constant 0 : i32
    %c0_i32_1 = arith.constant 0 : i32
    return %c0_i32, %c0_i32_0 : i32, i32
  }
  func.func @transform_3(%arg0: i32) -> (i32, i32) {
    %c0_i32 = arith.constant 0 : i32
    %c0_i32_0 = arith.constant 0 : i32
    %c0_i32_1 = arith.constant 0 : i32
    return %c0_i32, %c0_i32_0 : i32, i32
  }
}

</mosaic_0001>

<bundles_post_ra>
// kernel: tpu_custom_call.1
= control target key start
LH: loop header
LB: loop body
LE: loop exit
PB: predicated region body
PF: predicated region fallthrough
CT: control target
= control target key end

     0   :  { %9 = vsyncpa [#allocation3], 0  ;;  %s286_s0 = inlined_call_operand.hbm [shape: f32[3,512], index: 0, kind: input, shape index: {}]   ;;  %s287_s1 = inlined_call_operand.hbm [shape: s32[1,512], index: 1, kind: input, shape index: {}]   ;;  %s288_s2 = inlined_call_operand.hbm [shape: f32[1,1], index: 2, kind: output, shape index: {0}]   ;;  %s289_s3 = inlined_call_operand.hbm [shape: f32[1,1], index: 3, kind: output, shape index: {1}]  }
   0x1   :  { %10 = vsyncpa [#allocation6], 0 }
   0x2   :  { %11 = vsyncpa [#allocation4], 0 }
   0x3   :  { %12 = vsyncpa [#allocation9], 0  ;;  %s240_s12 = smov [#allocation2]   ;;  %s241_s14 = smov [#allocation5]  }
   0x4   :  { %s19_s13 = sshll.u32 %s240_s12, 4  ;;  %s29_s15 = sshll.u32 %s241_s14, 4  ;;  %s20_s13 = int_to_ptr.vmem [resolvable:$true] %s19_s13  ;;  %s30_s15 = int_to_ptr.vmem [resolvable:$true] %s29_s15 }
   0x5   :  { %s160_s16 = scalar_lea.vmem %s20_s13, 256  ;;  %p165_p1 = scmp.lt.s32.totalorder %s20_s13, %s20_s13 }
   0x6   :  { %p161_p0 = scmp.ne.s32.totalorder %s20_s13, %s160_s16  ;;  %p166_p2 = scmp.lt.s32.totalorder %s160_s16, %s160_s16 }
   0x8   :  { %p167_p3 = por %p166_p2, %p165_p1 }
   0xa   :  { %p168_p4 = pnand %p167_p3, %p161_p0 }
   0xc   :  { %171 = shalt.err (!%p168_p4)
}
   0xd   :  { %22 = dma.hbm_to_vmem [thread:$0]  %s286_s0, 256, %s20_s13, [#allocation3]  }
   0xe   :  { %s180_s19 = scalar_lea.vmem %s30_s15, 64  ;;  %p185_p6 = scmp.lt.s32.totalorder %s30_s15, %s30_s15 }
   0xf   :  { %p181_p5 = scmp.ne.s32.totalorder %s30_s15, %s180_s19  ;;  %p186_p7 = scmp.lt.s32.totalorder %s180_s19, %s180_s19 }
  0x11   :  { %p187_p8 = por %p186_p7, %p185_p6 }
  0x13   :  { %p188_p9 = pnand %p187_p8, %p181_p5 }
  0x15   :  { %191 = shalt.err (!%p188_p9)
}
  0x16   :  { %32 = dma.hbm_to_vmem [thread:$0]  %s287_s1, 64, %s30_s15, [#allocation6]  }
  0x17   :  { %232 = dma.done.wait [#allocation3], 256  }
  0x18   :  { %233 = vsyncadd [#allocation3], 4294967040 }
  0x19   :  { %234 = dma.done.wait [#allocation6], 64  }
  0x1a   :  { %235 = vsyncadd [#allocation6], 4294967232  ;;  %vm43_vm0 = vcmask 0   ;;  %v83_v0 = vlaneseq  ;;  %v242_v1 = vmov 0.0   ;;  %vm61_vm1 = vcmask 1042432   ;;  %s243_s0 = smov [#allocation8]  }
  0x1b   :  { %44 = vst.msk [vmem:[#allocation7] sm:$0x1] %vm43_vm0, %v242_v1  ;;  %45 = vst.msk [vmem:[#allocation8] sm:$0x1] %vm43_vm0, %v242_v1  ;;  %v46_v6 = vld [vmem:[#allocation2] sm:$0x77] }
  0x1c   :  { %v84_v2 = vshrl.u32 %v83_v0, 7  ;;  %v47_v7 = vld [vmem:[#allocation2 + $0x8] sm:$0x77]  ;;  %v48_v8 = vld [vmem:[#allocation5] sm:$0xf]  ;;  %v53_v9 = vmul.f32 %v46_v6, %v46_v6  ;;  %vm103_vm3 = vcmask 1040384  }
  0x1d   :  { %v54_v10 = vmul.f32 %v47_v7, %v47_v7  ;;  %vm49_vm2 = vcmp.ne.s32.totalorder %v48_v8, 255  ;;  %s132_s1 = sshll.u32 %s243_s0, 4  ;;  %s133_s1 = int_to_ptr.vmem [resolvable:$true] %s132_s1 }
  0x1e   :  { %v85_v3 = vsub.s32 0, %v84_v2  ;;  %v89_v4 = vsub.s32 1, %v84_v2  ;;  %v93_v5 = vsub.s32 2, %v84_v2  ;;  %v97_v11 = vsub.s32 3, %v84_v2  ;;  %s192_s22 = scalar_lea.vmem %s133_s1, 16  ;;  %s196_s23 = scalar_lea.vmem %s133_s1, 32 }
  0x1f   :  { %v146_v12 = vsel %vm49_vm2, 1.0, %v242_v1  ;;  %v57_v13 = vcombine.high %v53_v9, %v53_v9  ;;  %v58_v14 = vcombine.high %v54_v10, %v54_v10  ;;  %v62_v15 = vsel %vm61_vm1, %v53_v9, 0.0  ;;  %p193_p10 = scmp.ne.s32.totalorder %s133_s1, %s192_s22  ;;  %p197_p11 = scmp.lt.s32.totalorder %s133_s1, %s133_s1 }
  0x20   :  { %v86_v16 = vrot.slane %v146_v12, %v85_v3  ;;  %v90_v17 = vrot.slane %v146_v12, %v89_v4  ;;  %v94_v18 = vrot.slane %v146_v12, %v93_v5  ;;  %v65_v20 = vsel %vm61_vm1, %v54_v10, 0.0  ;;  %p198_p12 = scmp.lt.s32.totalorder %s196_s23, %s192_s22 }
  0x21   :  { %v63_v19 = vsel %vm61_vm1, %v57_v13, 0.0  ;;  %v98_v21 = vrot.slane %v146_v12, %v97_v11  ;;  %v67_v26 = vsel %vm61_vm1, %v58_v14, 0.0 }
  0x22   :  { %v64_v22 = vadd.f32 %v63_v19, %v62_v15  ;;  %v104_v23 = vsel %vm103_vm3, %v86_v16, 0.0  ;;  %v105_v24 = vsel %vm103_vm3, %v90_v17, 0.0  ;;  %v107_v25 = vsel %vm103_vm3, %v94_v18, 0.0  ;;  %v81_v36 = vld [vmem:[#allocation8] sm:$0x1]  ;;  %p199_p13 = por %p198_p12, %p197_p11 }
  0x23   :  { %v106_v27 = vadd.f32 %v105_v24, %v104_v23  ;;  %v109_v30 = vsel %vm103_vm3, %v98_v21, 0.0 }
  0x24   :  { %v66_v28 = vadd.f32 %v65_v20, %v64_v22  ;;  %p200_p0 = pnand %p199_p13, %p193_p10 }
  0x25   :  { %v108_v29 = vadd.f32 %v107_v25, %v106_v27 }
  0x26   :  { %v68_v31 = vadd.f32 %v67_v26, %v66_v28 }
  0x27   :  { %v110_v32 = vadd.f32 %v109_v30, %v108_v29 }
  0x28   :  { %69 = vadd.xlane.f32.xlu0 %v68_v31 }
  0x2c   :  { %111 = vadd.xlane.f32.xlu0 %v110_v32 }
  0xb1   :  { %v70_v33 = vpop.xlane.xlu0 %69 }
  0xb2   :  { %v71_v34 = vsel %vm61_vm1, %v70_v33, 0.0 }
  0xb3   :  { %v72_v35 = vrot.slane %v71_v34, 4 }
  0xb5   :  { %v73_v37 = vadd.f32 %v72_v35, %v71_v34  ;;  %v112_v38 = vpop.xlane.xlu0 %111 }
  0xb6   :  { %v114_v39 = vadd.f32 %v112_v38, %v81_v36 }
  0xb7   :  { %v74_v40 = vrot.slane %v73_v37, 2 }
  0xb8   :  { %115 = vst.msk [vmem:[#allocation8] sm:$0x1] %vm43_vm0, %v114_v39 }
  0xb9   :  { %v75_v41 = vadd.f32 %v74_v40, %v73_v37 }
  0xba   :  { %203 = shalt.err (!%p200_p0)
}
  0xbb   :  { %135 = dma.vmem_to_hbm [thread:$0]  %s133_s1, 16, %s289_s3, [#allocation9]   ;;  %v76_v42 = vrot.slane %v75_v41, 1  ;;  %v52_v43 = vld [vmem:[#allocation7] sm:$0x1] }
  0xbc   :  { %s244_s26 = smov [#allocation7]  }
  0xbd   :  { %s122_s27 = sshll.u32 %s244_s26, 4  ;;  %v77_v44 = vadd.f32 %v76_v42, %v75_v41  ;;  %s123_s27 = int_to_ptr.vmem [resolvable:$true] %s122_s27 }
  0xbe   :  { %s212_s28 = scalar_lea.vmem %s123_s27, 16  ;;  %s216_s29 = scalar_lea.vmem %s123_s27, 32 }
  0xbf   :  { %v78_v45 = vadd.f32 %v77_v44, %v52_v43  ;;  %p213_p1 = scmp.ne.s32.totalorder %s123_s27, %s212_s28  ;;  %p217_p2 = scmp.lt.s32.totalorder %s123_s27, %s123_s27 }
  0xc0   :  { %p218_p3 = scmp.lt.s32.totalorder %s216_s29, %s212_s28 }
  0xc1   :  { %80 = vst.msk [vmem:[#allocation7] sm:$0x1] %vm43_vm0, %v78_v45 }
  0xc2   :  { %p219_p4 = por %p218_p3, %p217_p2 }
  0xc4   :  { %p220_p5 = pnand %p219_p4, %p213_p1 }
  0xc6   :  { %223 = shalt.err (!%p220_p5)
}
  0xc7   :  { %125 = dma.vmem_to_hbm [thread:$0]  %s123_s27, 16, %s288_s2, [#allocation4]  }
  0xc8   :  { %236 = dma.done.wait [#allocation4], 16  }
  0xc9   :  { %237 = vsyncadd [#allocation4], 4294967280 }
  0xca   :  { %238 = dma.done.wait [#allocation9], 16  }
  0xcb   :  { %239 = vsyncadd [#allocation9], 4294967280 }
  0xcc   :  { %142 = vsyncpa [#allocation3], 1 }
  0xcd   :  { %143 = vsyncpa [#allocation6], 1 }
  0xce   :  { %144 = vsyncpa [#allocation4], 1 }
  0xcf   :  { %145 = vsyncpa [#allocation9], 1 }

</bundles_post_ra>
